<compile_context>
chip_gen: v5e
topology: v5e:2x2
jax: 0.10.0
libtpu: 0.0.40
codegen_flags: <defaults>
</compile_context>

<pallas_src>
import functools

import jax
import jax.numpy as jnp
from jax.experimental import pallas as pl
from jax.experimental.pallas import tpu as pltpu


def _round_up(x, m):
    return (x + m - 1) // m * m


def _custom_model_kernel(x_ref, w_ref, b_ref, out_ref, acc_ref, *, inv_s):
    # x_ref:   [TB, TS, H]  streamed hidden-state tile (f32 or bf16)
    # w_ref:   [H, C]       fc weight, transposed (f32)
    # b_ref:   [1, C]       fc bias (f32)
    # out_ref: [TB, C]      softmax probabilities
    # acc_ref: [TB, H]      f32 scratch accumulator (persists across seq steps)
    s = pl.program_id(1)

    @pl.when(s == 0)
    def _init():
        acc_ref[...] = jnp.zeros_like(acc_ref)

    # Streaming reduction over the sequence axis; accumulate in f32 regardless
    # of the (possibly bf16) input dtype.
    acc_ref[...] += jnp.sum(x_ref[...].astype(jnp.float32), axis=1)

    @pl.when(s == pl.num_programs(1) - 1)
    def _finalize():
        feat = acc_ref[...] * inv_s                    # mean over the true S
        logits = jnp.dot(feat, w_ref[...],
                         preferred_element_type=jnp.float32) + b_ref[...]
        # numerically-stable softmax along the class dim
        m = jnp.max(logits, axis=1, keepdims=True)
        e = jnp.exp(logits - m)
        out_ref[...] = (e / jnp.sum(e, axis=1, keepdims=True)).astype(out_ref.dtype)


def custom_model_forward(last_hidden_states, fc_weight_t, fc_bias, labels=None,
                         *, block_s=None, block_b=None):
    """JAX wrapper mirroring CustomModel.forward (inference path).

    last_hidden_states: [B, S, H]  float32 or bfloat16
    fc_weight_t:        [H, C]     (W^T of the nn.Linear, C = 5)
    fc_bias:            [C]
    Returns (softmax_output [B, C] float32, loss scalar 0.0).
    """
    B, S, H = last_hidden_states.shape
    C = fc_weight_t.shape[1]
    itemsize = jnp.dtype(last_hidden_states.dtype).itemsize

    # ---- tile selection ----------------------------------------------------
    if block_b is None:
        block_b = B if B <= 8 else 8           # 8-row batch tiles if B is large
    tb = block_b
    Bp = B if tb == B else _round_up(B, tb)

    if block_s is None:
        # ~4 MiB per streamed input tile -> ~8 MiB double-buffered: fits the
        # default scoped-VMEM budget on every TPU generation (incl. v7x's
        # 64 MiB total) while amortizing the ~0.35us per-grid-step overhead.
        target_bytes = 4 * 1024 * 1024
        block_s = max(1, target_bytes // max(1, tb * H * itemsize))
    if block_s >= S:
        ts, Sp = S, S
    else:
        ts = max(8, (block_s // 8) * 8)        # sublane-aligned sequence tile
        Sp = _round_up(S, ts)

    x = last_hidden_states
    if (Bp, Sp) != (B, S):
        # Zero padding: padded rows contribute 0 to the sum; we divide by the
        # true S, and padded batch rows are sliced off below.
        x = jnp.pad(x, ((0, Bp - B), (0, Sp - S), (0, 0)))

    w = fc_weight_t.astype(jnp.float32)
    b2d = fc_bias.reshape(1, C).astype(jnp.float32)

    grid = (Bp // tb, Sp // ts)

    cost = pl.CostEstimate(
        flops=Bp * Sp * H + 2 * Bp * H * C,
        transcendentals=Bp * C,
        bytes_accessed=Bp * Sp * H * itemsize + H * C * 4 + 2 * Bp * C * 4,
    )

    out = pl.pallas_call(
        functools.partial(_custom_model_kernel, inv_s=1.0 / S),
        out_shape=jax.ShapeDtypeStruct((Bp, C), jnp.float32),
        grid_spec=pltpu.PrefetchScalarGridSpec(
            num_scalar_prefetch=0,
            grid=grid,
            in_specs=[
                pl.BlockSpec((tb, ts, H), lambda bi, si: (bi, si, 0)),
                pl.BlockSpec((H, C), lambda bi, si: (0, 0)),
                pl.BlockSpec((1, C), lambda bi, si: (0, 0)),
            ],
            out_specs=pl.BlockSpec((tb, C), lambda bi, si: (bi, 0)),
            scratch_shapes=[pltpu.VMEM((tb, H), jnp.float32)],
        ),
        compiler_params=pltpu.CompilerParams(
            dimension_semantics=("parallel", "arbitrary")),
        cost_estimate=cost,
    )(x, w, b2d)

    if Bp != B:
        out = out[:B]

    # TODO(synk): FocalLoss training branch (labels is not None) not implemented;
    # forward with labels=None returns _loss = 0 exactly as in the PyTorch code.
    loss = jnp.float32(0.0)
    return out, loss


def _reference(x, w_t, b):
    feat = jnp.mean(x.astype(jnp.float32), axis=1)
    logits = feat @ w_t.astype(jnp.float32) + b.astype(jnp.float32)
    return jax.nn.softmax(logits, axis=1)


if __name__ == "__main__":
    key = jax.random.PRNGKey(0)
    k_x, k_w, k_x2 = jax.random.split(key, 3)

    C = 5
    initializer_range = 0.02

    # ---- test 1: small shapes, f32, single-tile path -----------------------
    B, S, H = 2, 8, 32
    x = jax.random.normal(k_x, (B, S, H), dtype=jnp.float32)
    fc_weight = initializer_range * jax.random.normal(k_w, (C, H), dtype=jnp.float32)
    fc_bias = jnp.zeros((C,), dtype=jnp.float32)

    out, loss = custom_model_forward(x, fc_weight.T, fc_bias, labels=None)
    out = jax.block_until_ready(out)
    assert jnp.allclose(out, _reference(x, fc_weight.T, fc_bias), atol=1e-5), \
        "f32 single-tile mismatch vs reference"

    # ---- test 2: gridded sequence accumulation with padding (S=20, ts=8) ---
    B2, S2 = 3, 20
    x2 = jax.random.normal(k_x2, (B2, S2, H), dtype=jnp.float32)
    out2, _ = custom_model_forward(x2, fc_weight.T, fc_bias, block_s=8)
    out2 = jax.block_until_ready(out2)
    assert jnp.allclose(out2, _reference(x2, fc_weight.T, fc_bias), atol=1e-5), \
        "f32 multi-tile (padded S) mismatch vs reference"

    # ---- test 3: bf16 streaming input (halved HBM traffic path) ------------
    x2_bf16 = x2.astype(jnp.bfloat16)
    out3, _ = custom_model_forward(x2_bf16, fc_weight.T, fc_bias, block_s=8)
    out3 = jax.block_until_ready(out3)
    assert jnp.allclose(out3, _reference(x2_bf16, fc_weight.T, fc_bias), atol=1e-4), \
        "bf16 multi-tile mismatch vs reference"

    print("KERNEL_OK")
</pallas_src>

<mosaic_0001>
module attributes {stable_mosaic.version = 11 : i64} {
  func.func @_custom_model_kernel(%arg0: i32, %arg1: i32, %arg2: memref<2x8x32xf32, #tpu.memory_space<vmem>>, %arg3: memref<32x5xf32, #tpu.memory_space<vmem>>, %arg4: memref<1x5xf32, #tpu.memory_space<vmem>>, %arg5: memref<2x5xf32, #tpu.memory_space<vmem>>, %arg6: memref<2x32xf32, #tpu.memory_space<vmem>>) attributes {dimension_semantics = [#tpu.dimension_semantics<parallel>, #tpu.dimension_semantics<arbitrary>], iteration_bounds = array<i64: 1, 1>, scalar_prefetch = 0 : i64, scratch_operands = 1 : i64, tpu.core_type = #tpu.core_type<tc>, window_params = [{transform_indices = @transform_0, window_bounds = array<i64: 2, 8, 32>}, {pipeline_mode = #tpu.pipeline_mode<synchronous>, transform_indices = @transform_1, window_bounds = array<i64: 32, 5>}, {pipeline_mode = #tpu.pipeline_mode<synchronous>, transform_indices = @transform_2, window_bounds = array<i64: 1, 5>}, {transform_indices = @transform_3, window_bounds = array<i64: 2, 5>}]} {
    %c0_i32 = arith.constant 0 : i32
    %0 = arith.cmpi eq, %arg1, %c0_i32 : i32
    %1 = arith.extui %0 : i1 to i32
    %c0_i32_0 = arith.constant 0 : i32
    %2 = arith.cmpi ne, %1, %c0_i32_0 : i32
    scf.if %2 {
      %cst_9 = arith.constant 0.000000e+00 : f32
      %11 = vector.broadcast %cst_9 : f32 to vector<2x32xf32>
      %c0_10 = arith.constant 0 : index
      %c0_11 = arith.constant 0 : index
      %12 = vector.load %arg6[%c0_10, %c0_11] : memref<2x32xf32, #tpu.memory_space<vmem>>, vector<2x32xf32>
      tpu.vector_store %arg6[%c0_10, %c0_11], %11 {strides = array<i32>} : memref<2x32xf32, #tpu.memory_space<vmem>>, vector<2x32xf32>,
    } else {
    }
    %c0 = arith.constant 0 : index
    %c0_1 = arith.constant 0 : index
    %3 = vector.load %arg6[%c0, %c0_1] : memref<2x32xf32, #tpu.memory_space<vmem>>, vector<2x32xf32>
    %c0_2 = arith.constant 0 : index
    %c0_3 = arith.constant 0 : index
    %c0_4 = arith.constant 0 : index
    %4 = vector.load %arg2[%c0_2, %c0_3, %c0_4] : memref<2x8x32xf32, #tpu.memory_space<vmem>>, vector<2x8x32xf32>
    %cst = arith.constant dense<0.000000e+00> : vector<2x32xf32>
    %5 = vector.multi_reduction <add>, %4, %cst [1] : vector<2x8x32xf32> to vector<2x32xf32>
    %6 = arith.addf %3, %5 : vector<2x32xf32>
    %c0_5 = arith.constant 0 : index
    %c0_6 = arith.constant 0 : index
    %7 = vector.load %arg6[%c0_5, %c0_6] : memref<2x32xf32, #tpu.memory_space<vmem>>, vector<2x32xf32>
    tpu.vector_store %arg6[%c0_5, %c0_6], %6 {strides = array<i32>} : memref<2x32xf32, #tpu.memory_space<vmem>>, vector<2x32xf32>,
    %c0_i32_7 = arith.constant 0 : i32
    %8 = arith.cmpi eq, %arg1, %c0_i32_7 : i32
    %9 = arith.extui %8 : i1 to i32
    %c0_i32_8 = arith.constant 0 : i32
    %10 = arith.cmpi ne, %9, %c0_i32_8 : i32
    scf.if %10 {
      %c0_9 = arith.constant 0 : index
      %c0_10 = arith.constant 0 : index
      %11 = vector.load %arg6[%c0_9, %c0_10] : memref<2x32xf32, #tpu.memory_space<vmem>>, vector<2x32xf32>
      %cst_11 = arith.constant 1.250000e-01 : f32
      %12 = vector.broadcast %cst_11 : f32 to vector<2x32xf32>
      %13 = arith.mulf %11, %12 : vector<2x32xf32>
      %c0_12 = arith.constant 0 : index
      %c0_13 = arith.constant 0 : index
      %14 = vector.load %arg3[%c0_12, %c0_13] : memref<32x5xf32, #tpu.memory_space<vmem>>, vector<32x5xf32>
      %cst_14 = arith.constant dense<0.000000e+00> : vector<2x5xf32>
      %15 = tpu.matmul %13, %14, %cst_14 {dimension_numbers = #tpu.dot_dimension_numbers<[1], [0], [0], [1], [0, 0, 1, 1], [], []>} : vector<2x32xf32>, vector<32x5xf32>, vector<2x5xf32> -> vector<2x5xf32>
      %c0_15 = arith.constant 0 : index
      %c0_16 = arith.constant 0 : index
      %16 = vector.load %arg4[%c0_15, %c0_16] : memref<1x5xf32, #tpu.memory_space<vmem>>, vector<1x5xf32>
      %17 = vector.broadcast %16 : vector<1x5xf32> to vector<2x5xf32>
      %18 = arith.addf %15, %17 : vector<2x5xf32>
      %cst_17 = arith.constant dense<0xFF800000> : vector<2xf32>
      %19 = vector.multi_reduction <maximumf>, %18, %cst_17 [1] : vector<2x5xf32> to vector<2xf32>
      %20 = vector.shape_cast %19 : vector<2xf32> to vector<2x1xf32>
      %21 = vector.broadcast %20 : vector<2x1xf32> to vector<2x5xf32>
      %22 = arith.subf %18, %21 : vector<2x5xf32>
      %23 = math.exp %22 : vector<2x5xf32>
      %cst_18 = arith.constant dense<0.000000e+00> : vector<2xf32>
      %24 = vector.multi_reduction <add>, %23, %cst_18 [1] : vector<2x5xf32> to vector<2xf32>
      %25 = vector.shape_cast %24 : vector<2xf32> to vector<2x1xf32>
      %26 = vector.broadcast %25 : vector<2x1xf32> to vector<2x5xf32>
      %27 = arith.divf %23, %26 : vector<2x5xf32>
      %c0_19 = arith.constant 0 : index
      %c0_20 = arith.constant 0 : index
      %28 = vector.load %arg5[%c0_19, %c0_20] : memref<2x5xf32, #tpu.memory_space<vmem>>, vector<2x5xf32>
      tpu.vector_store %arg5[%c0_19, %c0_20], %27 {strides = array<i32>} : memref<2x5xf32, #tpu.memory_space<vmem>>, vector<2x5xf32>,
    } else {
    }
    return
  }
  func.func @transform_0(%arg0: i32, %arg1: i32) -> (i32, i32, i32) {
    %c0_i32 = arith.constant 0 : i32
    %c0_i32_0 = arith.constant 0 : i32
    return %arg0, %arg1, %c0_i32 : i32, i32, i32
  }
  func.func @transform_1(%arg0: i32, %arg1: i32) -> (i32, i32) {
    %c0_i32 = arith.constant 0 : i32
    %c0_i32_0 = arith.constant 0 : i32
    %c0_i32_1 = arith.constant 0 : i32
    return %c0_i32, %c0_i32_0 : i32, i32
  }
  func.func @transform_2(%arg0: i32, %arg1: i32) -> (i32, i32) {
    %c0_i32 = arith.constant 0 : i32
    %c0_i32_0 = arith.constant 0 : i32
    %c0_i32_1 = arith.constant 0 : i32
    return %c0_i32, %c0_i32_0 : i32, i32
  }
  func.func @transform_3(%arg0: i32, %arg1: i32) -> (i32, i32) {
    %c0_i32 = arith.constant 0 : i32
    %c0_i32_0 = arith.constant 0 : i32
    return %arg0, %c0_i32 : i32, i32
  }
}

</mosaic_0001>

<bundles_post_ra>
// kernel: tpu_custom_call.1
= control target key start
LH: loop header
LB: loop body
LE: loop exit
PB: predicated region body
PF: predicated region fallthrough
CT: control target
= control target key end

     0   :  { %vm19_vm0 = vcmask 254976   ;;  %vm24_vm1 = vcmask 261120   ;;  %v159_v2 = vmov 0.0   ;;  %s213_s0 = inlined_call_operand.vmem [shape: f32[2,8,32], index: 0, kind: input, shape index: {}]   ;;  %s214_s1 = inlined_call_operand.vmem [shape: f32[32,5], index: 1, kind: input, shape index: {}]   ;;  %s215_s2 = inlined_call_operand.vmem [shape: f32[1,5], index: 2, kind: input, shape index: {}]   ;;  %s216_s3 = inlined_call_operand.hbm [shape: f32[2,5], index: 3, kind: output, shape index: {}]  }
   0x1   :  { %v55_v0 = vld [vmem:[%s214_s1 + $0x18] sm:$0xff]  ;;  %v54_v1 = vld [vmem:[%s214_s1 + $0x10] sm:$0xff]  ;;  %20 = vst.msk [vmem:[#allocation2] sm:$0x3] %vm19_vm0, %v159_v2  ;;  %v22_v3 = vld [vmem:[%s213_s0] sm:$0xff] }
   0x2   :  { %75 = vmatpush.msra.mxu0 %v55_v0  ;;  %v23_v4 = vld [vmem:[%s213_s0 + $0x8] sm:$0xff]  ;;  %v25_v6 = vsel %vm24_vm1, %v22_v3, 0.0 }
   0x3   :  { %v53_v5 = vld [vmem:[%s214_s1 + $0x8] sm:$0xff]  ;;  %v32_v7 = vsel %vm24_vm1, %v23_v4, 0.0  ;;  %v26_v8 = vrot.slane %v25_v6, 4 }
   0x4   :  { %76 = vmatpush.msra.mxu0 %v54_v1  ;;  %v33_v9 = vrot.slane %v32_v7, 4 }
   0x5   :  { %8 = vsyncpa [#allocation4], 0  ;;  %v52_v10 = vld [vmem:[%s214_s1] sm:$0xff]  ;;  %v27_v11 = vadd.f32 %v26_v8, %v25_v6  ;;  %vm41_vm2 = vcmask 1041409   ;;  %vm83_vm3 = vcmask 33792   ;;  %s116_s27 = sshll.u32 %s216_s3, 4  ;;  %s117_s27 = int_to_ptr.hbm [resolvable:$true] %s116_s27 }
   0x6   :  { %77 = vmatpush.msra.mxu0 %v53_v5  ;;  %v34_v12 = vadd.f32 %v33_v9, %v32_v7  ;;  %v128_v26 = vld [vmem:[%s215_s2] ss:$0 sm:$0xff]  ;;  %s160_s2 = smov [#allocation3]  }
   0x7   :  { %v28_v13 = vrot.slane %v27_v11, 2  ;;  %s114_s24 = sshll.u32 %s160_s2, 4  ;;  %s115_s24 = int_to_ptr.vmem [resolvable:$true] %s114_s24 }
   0x8   :  { %78 = vmatpush.msra.mxu0 %v52_v10  ;;  %v35_v14 = vrot.slane %v34_v12, 2  ;;  %v21_v19 = vld [vmem:[#allocation2] sm:$0x3] }
   0x9   :  { %v29_v15 = vadd.f32 %v28_v13, %v27_v11 }
   0xa   :  { %v36_v16 = vadd.f32 %v35_v14, %v34_v12 }
   0xb   :  { %v30_v17 = vrot.slane %v29_v15, 1 }
   0xc   :  { %v37_v18 = vrot.slane %v36_v16, 1 }
   0xd   :  { %v31_v20 = vadd.f32 %v30_v17, %v29_v15 }
   0xe   :  { %v38_v21 = vadd.f32 %v37_v18, %v36_v16 }
  0x10   :  { %v42_v22 = vsel %vm41_vm2, %v38_v21, %v31_v20 }
  0x11   :  { %v44_v23 = vadd.f32 %v42_v22, %v21_v19 }
  0x13   :  { %46 = vst.msk [vmem:[#allocation2] sm:$0x3] %vm19_vm0, %v44_v23 }
  0x1a   :  { %v50_v24 = vld [vmem:[#allocation2] sm:$0x3] }
  0x1b   :  { %v51_v25 = vmul.f32 0.125, %v50_v24 }
  0x1d   :  { %125 = vmatmul.msk.f32.vlgmr.msra.gmra.mxu0 %vm24_vm1, %v51_v25 }
  0x9a   :  { %v80_v27 = vpop.f32.mrf.mxu0 }
  0x9b   :  { %v81_v28 = vadd.f32 %v128_v26, %v80_v27 }
  0x9d   :  { %v84_v29 = vsel %vm83_vm3, %v81_v28, -inf }
  0x9e   :  { %85 = vmax.xlane.f32.xlu0 %v84_v29 }
 0x111   :  { %v86_v30 = vpop.xlane.xlu0 %85 }
 0x112   :  { %v87_v31 = vsub.f32 %v81_v28, %v86_v30 }
 0x114   :  { %v88_v32 = vmul.f32 1.442695, %v87_v31 }
 0x116   :  { %129 = vpow2.f32 %v88_v32 }
 0x11c   :  { %v130_v33 = vpop.eup %129 }
 0x11d   :  { %v90_v34 = vsel %vm83_vm3, %v130_v33, 0.0 }
 0x11e   :  { %91 = vadd.xlane.f32.xlu0 %v90_v34 }
 0x191   :  { %v92_v35 = vpop.xlane.xlu0 %91 }
 0x192   :  { %131 = vrcp.f32 %v92_v35  ;;  %v104_v39 = vand.u32 2147483648, %v92_v35  ;;  %v102_v41 = vand.u32 2147483647, %v92_v35  ;;  %vm98_vm5 = vweird.f32 %v92_v35 }
 0x194   :  { %v105_v43 = vor.u32 1.1754944e-38, %v104_v39  ;;  %vm103_vm7 = vcmp.eq.f32.partialorder %v102_v41, 8.507059e+37 }
 0x198   :  { %v132_v36 = vpop.eup %131 }
 0x199   :  { %v94_v37 = vmul.f32 %v132_v36, %v92_v35  ;;  %vm99_vm4 = vweird.f32 %v132_v36 }
 0x19a   :  { %vm100_vm6 = vmor %vm98_vm5, %vm99_vm4 }
 0x19b   :  { %v95_v38 = vsub.f32 1.0, %v94_v37 }
 0x19d   :  { %v96_v40 = vmul.f32 %v132_v36, %v95_v38 }
 0x19f   :  { %v97_v42 = vadd.f32 %v132_v36, %v96_v40 }
 0x1a1   :  { %v101_v44 = vsel %vm100_vm6, %v132_v36, %v97_v42 }
 0x1a2   :  { %v106_v45 = vsel %vm103_vm7, %v105_v43, %v101_v44 }
 0x1a3   :  { %v107_v46 = vmul.f32 %v130_v33, %v106_v45 }
 0x1a5   :  { %108 = vst.msk [vmem:[#allocation3] sm:$0x3] %vm83_vm3, %v107_v46 }
 0x1a6   :  { %119 = dma.vmem_to_hbm [thread:$0]  %s115_s24, 32, %s117_s27, [#allocation4]  }
 0x1a7   :  { %157 = dma.done.wait [#allocation4], 32  }
 0x1a8   :  { %158 = vsyncadd [#allocation4], 4294967264 }
 0x1a9   :  { %124 = vsyncpa [#allocation4], 1 }

</bundles_post_ra>
